<compile_context>
chip_gen: v6e
topology: v6e:2x2x1
jax: 0.10.0
libtpu: 0.0.40
codegen_flags: <defaults>
</compile_context>

<pallas_src>
import jax
import jax.numpy as jnp
from jax.experimental import pallas as pl
from jax.experimental.pallas import tpu as pltpu


def _round_up(v, m):
    return ((v + m - 1) // m) * m


def ffn_kernel(x_ref, w1t_ref, b1_ref, w2t_ref, b2_ref, gamma_ref, beta_ref,
               o_ref, acc_ref):
    # Grid: (M tiles ['parallel'], FF chunks ['arbitrary' reduction]).
    j = pl.program_id(1)

    x = x_ref[...]                                   # (TM, E), f32

    @pl.when(j == 0)
    def _():
        # Fold the residual and the second conv's bias into the accumulator init.
        acc_ref[...] = x.astype(jnp.float32) + b2_ref[...]

    # h_chunk = relu(x @ W1^T[:, ff_chunk] + b1[ff_chunk])  -- bf16 MXU, f32 accum
    h = jnp.dot(x.astype(jnp.bfloat16), w1t_ref[...],
                preferred_element_type=jnp.float32) + b1_ref[...]
    h = jnp.maximum(h, 0.0)                          # (TM, TFF), f32

    # y += h_chunk @ W2^T[ff_chunk, :]
    acc_ref[...] += jnp.dot(h.astype(jnp.bfloat16), w2t_ref[...],
                            preferred_element_type=jnp.float32)

    @pl.when(j == pl.num_programs(1) - 1)
    def _():
        # TODO(synk): dropout is identity here (inference / eval mode); no RNG masking.
        z = acc_ref[...]                             # (TM, E) = y + x + b2
        mean = jnp.mean(z, axis=-1, keepdims=True)
        zc = z - mean
        var = jnp.mean(zc * zc, axis=-1, keepdims=True)
        inv = jax.lax.rsqrt(var + 1e-5)              # nn.LayerNorm default eps
        o_ref[...] = (zc * inv * gamma_ref[...] + beta_ref[...]).astype(o_ref.dtype)


def positionwise_feed_forward(x, w1, b1, w2, b2, gamma, beta):
    """x: (B, S, E) f32. w1: (FF, E), b1: (FF,), w2: (E, FF), b2: (E,),
    gamma/beta: (E,). Returns (B, S, E)."""
    B, S, E = x.shape
    FF = w1.shape[0]
    M = B * S

    # ---- tile selection (blocks either equal the full dim or are 8/128-aligned) ----
    TM = 512 if M > 512 else M
    M_pad = _round_up(M, TM)
    TFF = 512 if FF > 512 else FF          # 512 is a multiple of 128 when tiling
    FF_pad = _round_up(FF, TFF)

    # ---- wrapper-side glue: flatten, pad, pre-transpose, cast MXU weights to bf16 ----
    xm = x.reshape(M, E)
    if M_pad != M:
        xm = jnp.pad(xm, ((0, M_pad - M), (0, 0)))

    w1t = w1.T.astype(jnp.bfloat16)        # (E, FF)
    w2t = w2.T.astype(jnp.bfloat16)        # (FF, E)
    b1r = b1.reshape(1, FF).astype(jnp.float32)
    if FF_pad != FF:
        w1t = jnp.pad(w1t, ((0, 0), (0, FF_pad - FF)))
        w2t = jnp.pad(w2t, ((0, FF_pad - FF), (0, 0)))
        b1r = jnp.pad(b1r, ((0, 0), (0, FF_pad - FF)))
    b2r = b2.reshape(1, E).astype(jnp.float32)
    gammar = gamma.reshape(1, E).astype(jnp.float32)
    betar = beta.reshape(1, E).astype(jnp.float32)

    # ---- VMEM budget: double-buffered streamed operands + f32 accumulator ----
    est = (2 * TM * E * 4            # x tiles (f32)
           + 2 * TM * E * 4          # out tiles (f32)
           + 2 * E * TFF * 2         # W1^T chunks (bf16)
           + 2 * TFF * E * 2         # W2^T chunks (bf16)
           + 2 * TFF * 4             # b1 chunks
           + 2 * 3 * E * 4           # b2, gamma, beta
           + TM * E * 4)             # accumulator scratch
    vmem_limit = min(2 * est + (8 << 20), 64 << 20)

    grid = (M_pad // TM, FF_pad // TFF)

    out = pl.pallas_call(
        ffn_kernel,
        out_shape=jax.ShapeDtypeStruct((M_pad, E), x.dtype),
        grid_spec=pltpu.PrefetchScalarGridSpec(
            num_scalar_prefetch=0,
            grid=grid,
            in_specs=[
                pl.BlockSpec((TM, E), lambda i, j: (i, 0)),    # x tile
                pl.BlockSpec((E, TFF), lambda i, j: (0, j)),   # W1^T chunk
                pl.BlockSpec((1, TFF), lambda i, j: (0, j)),   # b1 chunk
                pl.BlockSpec((TFF, E), lambda i, j: (j, 0)),   # W2^T chunk
                pl.BlockSpec((1, E), lambda i, j: (0, 0)),     # b2
                pl.BlockSpec((1, E), lambda i, j: (0, 0)),     # gamma
                pl.BlockSpec((1, E), lambda i, j: (0, 0)),     # beta
            ],
            out_specs=pl.BlockSpec((TM, E), lambda i, j: (i, 0)),
            scratch_shapes=[pltpu.VMEM((TM, E), jnp.float32)],
        ),
        compiler_params=pltpu.CompilerParams(
            dimension_semantics=("parallel", "arbitrary"),
            vmem_limit_bytes=int(vmem_limit),
        ),
    )(xm, w1t, b1r, w2t, b2r, gammar, betar)

    return out[:M].reshape(B, S, E)


def reference(x, w1, b1, w2, b2, gamma, beta):
    """Pure-JAX f32 reference matching the PyTorch forward (dropout = identity)."""
    h = jnp.maximum(jnp.einsum("bse,fe->bsf", x, w1) + b1, 0.0)
    y = jnp.einsum("bsf,ef->bse", h, w2) + b2
    z = y + x
    mean = jnp.mean(z, axis=-1, keepdims=True)
    var = jnp.mean((z - mean) ** 2, axis=-1, keepdims=True)
    return (z - mean) / jnp.sqrt(var + 1e-5) * gamma + beta


if __name__ == "__main__":
    B, S, E, FF = 2, 8, 32, 64

    key = jax.random.PRNGKey(0)
    kx, k1, kb1, k2, kb2 = jax.random.split(key, 5)

    x = jax.random.normal(kx, (B, S, E), dtype=jnp.float32)
    w1 = jax.random.normal(k1, (FF, E), dtype=jnp.float32) * (1.0 / jnp.sqrt(E))
    b1 = jax.random.normal(kb1, (FF,), dtype=jnp.float32) * 0.01
    w2 = jax.random.normal(k2, (E, FF), dtype=jnp.float32) * (1.0 / jnp.sqrt(FF))
    b2 = jax.random.normal(kb2, (E,), dtype=jnp.float32) * 0.01
    gamma = jnp.ones((E,), dtype=jnp.float32)
    beta = jnp.zeros((E,), dtype=jnp.float32)

    out = positionwise_feed_forward(x, w1, b1, w2, b2, gamma, beta)
    out = jax.block_until_ready(out)

    ref = reference(x, w1, b1, w2, b2, gamma, beta)
    assert out.shape == (B, S, E)
    # bf16 MXU operands vs the f32 reference -> loosened tolerance.
    assert jnp.allclose(out, ref, atol=5e-2, rtol=5e-2), "mismatch vs reference"

    print("KERNEL_OK")
</pallas_src>

<mosaic_0001>
module attributes {stable_mosaic.version = 11 : i64} {
  func.func @ffn_kernel(%arg0: i32, %arg1: i32, %arg2: memref<16x32xf32, #tpu.memory_space<vmem>>, %arg3: memref<32x64xbf16, #tpu.memory_space<vmem>>, %arg4: memref<1x64xf32, #tpu.memory_space<vmem>>, %arg5: memref<64x32xbf16, #tpu.memory_space<vmem>>, %arg6: memref<1x32xf32, #tpu.memory_space<vmem>>, %arg7: memref<1x32xf32, #tpu.memory_space<vmem>>, %arg8: memref<1x32xf32, #tpu.memory_space<vmem>>, %arg9: memref<16x32xf32, #tpu.memory_space<vmem>>, %arg10: memref<16x32xf32, #tpu.memory_space<vmem>>) attributes {dimension_semantics = [#tpu.dimension_semantics<parallel>, #tpu.dimension_semantics<arbitrary>], iteration_bounds = array<i64: 1, 1>, scalar_prefetch = 0 : i64, scratch_operands = 1 : i64, tpu.core_type = #tpu.core_type<tc>, window_params = [{transform_indices = @transform_0, window_bounds = array<i64: 16, 32>}, {transform_indices = @transform_1, window_bounds = array<i64: 32, 64>}, {transform_indices = @transform_2, window_bounds = array<i64: 1, 64>}, {transform_indices = @transform_3, window_bounds = array<i64: 64, 32>}, {pipeline_mode = #tpu.pipeline_mode<synchronous>, transform_indices = @transform_4, window_bounds = array<i64: 1, 32>}, {pipeline_mode = #tpu.pipeline_mode<synchronous>, transform_indices = @transform_5, window_bounds = array<i64: 1, 32>}, {pipeline_mode = #tpu.pipeline_mode<synchronous>, transform_indices = @transform_6, window_bounds = array<i64: 1, 32>}, {transform_indices = @transform_7, window_bounds = array<i64: 16, 32>}]} {
    %c0 = arith.constant 0 : index
    %c0_0 = arith.constant 0 : index
    %0 = vector.load %arg2[%c0, %c0_0] : memref<16x32xf32, #tpu.memory_space<vmem>>, vector<16x32xf32>
    %c0_i32 = arith.constant 0 : i32
    %1 = arith.cmpi eq, %arg1, %c0_i32 : i32
    %2 = arith.extui %1 : i1 to i32
    %c0_i32_1 = arith.constant 0 : i32
    %3 = arith.cmpi ne, %2, %c0_i32_1 : i32
    scf.if %3 {
      %c0_16 = arith.constant 0 : index
      %c0_17 = arith.constant 0 : index
      %21 = vector.load %arg6[%c0_16, %c0_17] : memref<1x32xf32, #tpu.memory_space<vmem>>, vector<1x32xf32>
      %22 = vector.broadcast %21 : vector<1x32xf32> to vector<16x32xf32>
      %23 = arith.addf %0, %22 : vector<16x32xf32>
      %c0_18 = arith.constant 0 : index
      %c0_19 = arith.constant 0 : index
      %24 = vector.load %arg10[%c0_18, %c0_19] : memref<16x32xf32, #tpu.memory_space<vmem>>, vector<16x32xf32>
      tpu.vector_store %arg10[%c0_18, %c0_19], %23 {strides = array<i32>} : memref<16x32xf32, #tpu.memory_space<vmem>>, vector<16x32xf32>,
    } else {
    }
    %4 = arith.truncf %0 : vector<16x32xf32> to vector<16x32xbf16>
    %c0_2 = arith.constant 0 : index
    %c0_3 = arith.constant 0 : index
    %5 = vector.load %arg3[%c0_2, %c0_3] : memref<32x64xbf16, #tpu.memory_space<vmem>>, vector<32x64xbf16>
    %cst = arith.constant dense<0.000000e+00> : vector<16x64xf32>
    %6 = tpu.matmul %4, %5, %cst {dimension_numbers = #tpu.dot_dimension_numbers<[1], [0], [0], [1], [0, 0, 1, 1], [], []>} : vector<16x32xbf16>, vector<32x64xbf16>, vector<16x64xf32> -> vector<16x64xf32>
    %c0_4 = arith.constant 0 : index
    %c0_5 = arith.constant 0 : index
    %7 = vector.load %arg4[%c0_4, %c0_5] : memref<1x64xf32, #tpu.memory_space<vmem>>, vector<1x64xf32>
    %8 = vector.broadcast %7 : vector<1x64xf32> to vector<16x64xf32>
    %9 = arith.addf %6, %8 : vector<16x64xf32>
    %cst_6 = arith.constant 0.000000e+00 : f32
    %10 = vector.broadcast %cst_6 : f32 to vector<16x64xf32>
    %11 = arith.maximumf %9, %10 : vector<16x64xf32>
    %c0_7 = arith.constant 0 : index
    %c0_8 = arith.constant 0 : index
    %12 = vector.load %arg10[%c0_7, %c0_8] : memref<16x32xf32, #tpu.memory_space<vmem>>, vector<16x32xf32>
    %13 = arith.truncf %11 : vector<16x64xf32> to vector<16x64xbf16>
    %c0_9 = arith.constant 0 : index
    %c0_10 = arith.constant 0 : index
    %14 = vector.load %arg5[%c0_9, %c0_10] : memref<64x32xbf16, #tpu.memory_space<vmem>>, vector<64x32xbf16>
    %cst_11 = arith.constant dense<0.000000e+00> : vector<16x32xf32>
    %15 = tpu.matmul %13, %14, %cst_11 {dimension_numbers = #tpu.dot_dimension_numbers<[1], [0], [0], [1], [0, 0, 1, 1], [], []>} : vector<16x64xbf16>, vector<64x32xbf16>, vector<16x32xf32> -> vector<16x32xf32>
    %16 = arith.addf %12, %15 : vector<16x32xf32>
    %c0_12 = arith.constant 0 : index
    %c0_13 = arith.constant 0 : index
    %17 = vector.load %arg10[%c0_12, %c0_13] : memref<16x32xf32, #tpu.memory_space<vmem>>, vector<16x32xf32>
    tpu.vector_store %arg10[%c0_12, %c0_13], %16 {strides = array<i32>} : memref<16x32xf32, #tpu.memory_space<vmem>>, vector<16x32xf32>,
    %c0_i32_14 = arith.constant 0 : i32
    %18 = arith.cmpi eq, %arg1, %c0_i32_14 : i32
    %19 = arith.extui %18 : i1 to i32
    %c0_i32_15 = arith.constant 0 : i32
    %20 = arith.cmpi ne, %19, %c0_i32_15 : i32
    scf.if %20 {
      %c0_16 = arith.constant 0 : index
      %c0_17 = arith.constant 0 : index
      %21 = vector.load %arg10[%c0_16, %c0_17] : memref<16x32xf32, #tpu.memory_space<vmem>>, vector<16x32xf32>
      %cst_18 = arith.constant dense<0.000000e+00> : vector<16xf32>
      %22 = vector.multi_reduction <add>, %21, %cst_18 [1] : vector<16x32xf32> to vector<16xf32>
      %23 = vector.shape_cast %22 : vector<16xf32> to vector<16x1xf32>
      %cst_19 = arith.constant 3.200000e+01 : f32
      %24 = vector.broadcast %cst_19 : f32 to vector<16x1xf32>
      %25 = arith.divf %23, %24 : vector<16x1xf32>
      %26 = vector.broadcast %25 : vector<16x1xf32> to vector<16x32xf32>
      %27 = arith.subf %21, %26 : vector<16x32xf32>
      %28 = arith.mulf %27, %27 : vector<16x32xf32>
      %cst_20 = arith.constant dense<0.000000e+00> : vector<16xf32>
      %29 = vector.multi_reduction <add>, %28, %cst_20 [1] : vector<16x32xf32> to vector<16xf32>
      %30 = vector.shape_cast %29 : vector<16xf32> to vector<16x1xf32>
      %cst_21 = arith.constant 3.200000e+01 : f32
      %31 = vector.broadcast %cst_21 : f32 to vector<16x1xf32>
      %32 = arith.divf %30, %31 : vector<16x1xf32>
      %cst_22 = arith.constant 9.99999974E-6 : f32
      %33 = vector.broadcast %cst_22 : f32 to vector<16x1xf32>
      %34 = arith.addf %32, %33 : vector<16x1xf32>
      %35 = math.rsqrt %34 : vector<16x1xf32>
      %36 = vector.broadcast %35 : vector<16x1xf32> to vector<16x32xf32>
      %37 = arith.mulf %27, %36 : vector<16x32xf32>
      %c0_23 = arith.constant 0 : index
      %c0_24 = arith.constant 0 : index
      %38 = vector.load %arg7[%c0_23, %c0_24] : memref<1x32xf32, #tpu.memory_space<vmem>>, vector<1x32xf32>
      %39 = vector.broadcast %38 : vector<1x32xf32> to vector<16x32xf32>
      %40 = arith.mulf %37, %39 : vector<16x32xf32>
      %c0_25 = arith.constant 0 : index
      %c0_26 = arith.constant 0 : index
      %41 = vector.load %arg8[%c0_25, %c0_26] : memref<1x32xf32, #tpu.memory_space<vmem>>, vector<1x32xf32>
      %42 = vector.broadcast %41 : vector<1x32xf32> to vector<16x32xf32>
      %43 = arith.addf %40, %42 : vector<16x32xf32>
      %c0_27 = arith.constant 0 : index
      %c0_28 = arith.constant 0 : index
      %44 = vector.load %arg9[%c0_27, %c0_28] : memref<16x32xf32, #tpu.memory_space<vmem>>, vector<16x32xf32>
      tpu.vector_store %arg9[%c0_27, %c0_28], %43 {strides = array<i32>} : memref<16x32xf32, #tpu.memory_space<vmem>>, vector<16x32xf32>,
    } else {
    }
    return
  }
  func.func @transform_0(%arg0: i32, %arg1: i32) -> (i32, i32) {
    %c0_i32 = arith.constant 0 : i32
    %c0_i32_0 = arith.constant 0 : i32
    return %arg0, %c0_i32 : i32, i32
  }
  func.func @transform_1(%arg0: i32, %arg1: i32) -> (i32, i32) {
    %c0_i32 = arith.constant 0 : i32
    %c0_i32_0 = arith.constant 0 : i32
    return %c0_i32, %arg1 : i32, i32
  }
  func.func @transform_2(%arg0: i32, %arg1: i32) -> (i32, i32) {
    %c0_i32 = arith.constant 0 : i32
    %c0_i32_0 = arith.constant 0 : i32
    return %c0_i32, %arg1 : i32, i32
  }
  func.func @transform_3(%arg0: i32, %arg1: i32) -> (i32, i32) {
    %c0_i32 = arith.constant 0 : i32
    %c0_i32_0 = arith.constant 0 : i32
    return %arg1, %c0_i32 : i32, i32
  }
  func.func @transform_4(%arg0: i32, %arg1: i32) -> (i32, i32) {
    %c0_i32 = arith.constant 0 : i32
    %c0_i32_0 = arith.constant 0 : i32
    %c0_i32_1 = arith.constant 0 : i32
    return %c0_i32, %c0_i32_0 : i32, i32
  }
  func.func @transform_5(%arg0: i32, %arg1: i32) -> (i32, i32) {
    %c0_i32 = arith.constant 0 : i32
    %c0_i32_0 = arith.constant 0 : i32
    %c0_i32_1 = arith.constant 0 : i32
    return %c0_i32, %c0_i32_0 : i32, i32
  }
  func.func @transform_6(%arg0: i32, %arg1: i32) -> (i32, i32) {
    %c0_i32 = arith.constant 0 : i32
    %c0_i32_0 = arith.constant 0 : i32
    %c0_i32_1 = arith.constant 0 : i32
    return %c0_i32, %c0_i32_0 : i32, i32
  }
  func.func @transform_7(%arg0: i32, %arg1: i32) -> (i32, i32) {
    %c0_i32 = arith.constant 0 : i32
    %c0_i32_0 = arith.constant 0 : i32
    return %arg0, %c0_i32 : i32, i32
  }
}

</mosaic_0001>

<bundles_post_ra>
// kernel: tpu_custom_call.1
= control target key start
LH: loop header
LB: loop body
LE: loop exit
PB: predicated region body
PF: predicated region fallthrough
CT: control target
= control target key end

     0   :  { %v346_v1 = vmov 0.0   ;;  %vm347_vm0 = vmmov 0   ;;  %vm43_vm1 = vcmask 261120   ;;  %s441_s0 = inlined_call_operand.vmem [shape: f32[16,32], index: 0, kind: input, shape index: {}]   ;;  %s442_s1 = inlined_call_operand.vmem [shape: bf16[32,64], index: 1, kind: input, shape index: {}]   ;;  %s443_s2 = inlined_call_operand.vmem [shape: f32[1,64], index: 2, kind: input, shape index: {}]   ;;  %s444_s3 = inlined_call_operand.vmem [shape: bf16[64,32], index: 3, kind: input, shape index: {}]   ;;  %s445_s4 = inlined_call_operand.vmem [shape: f32[1,32], index: 4, kind: input, shape index: {}]   ;;  %s446_s5 = inlined_call_operand.vmem [shape: f32[1,32], index: 5, kind: input, shape index: {}]   ;;  %s447_s6 = inlined_call_operand.vmem [shape: f32[1,32], index: 6, kind: input, shape index: {}]   ;;  %s448_s7 = inlined_call_operand.hbm [shape: f32[16,32], index: 7, kind: output, shape index: {}]  }
   0x1   :  { %v314_v0 = vld [vmem:[%s442_s1 + $0x8] sm:$0xff]   ;;  %289 = vmatprep.subr.bf16.mxu0 %v346_v1  ;;  %v315_v2 = vld [vmem:[%s442_s1] sm:$0xff]   ;;  %297 = vmatprep.subr.bf16.mxu1 %v346_v1  ;;  %v316_v8 = vld [vmem:[%s444_s3 + $0x18] sm:$0xff]  }
   0x2   :  { %290 = vmatpush3.bf16.msra.mxu0 %v314_v0  ;;  %293 = vmatprep.mubr.msk.bf16.mxu0 %vm347_vm0, %v346_v1  ;;  %v28_v3 = vld [vmem:[%s441_s0] sm:$0xff]  ;;  %v29_v4 = vld [vmem:[%s441_s0 + $0x8] sm:$0xff] }
   0x3   :  { %v269_v5 = vld [vmem:[%s445_s4] ss:$0 sm:$0xff]  ;;  %291 = vmatprep.subr.bf16.mxu0 %v346_v1  ;;  %305 = vmatprep.mubr.msk.bf16.mxu1 %vm347_vm0, %v346_v1  ;;  %v46_v9 = vpack.c.bf16 %v29_v4, %v28_v3 }
   0x4   :  { %v41_v6 = vadd.f32 %v269_v5, %v28_v3  ;;  %v42_v7 = vadd.f32 %v269_v5, %v29_v4  ;;  %298 = vmatpush3.bf16.msra.mxu1 %v316_v8 }
   0x5   :  { %299 = vmatprep.subr.bf16.mxu1 %v346_v1 }
   0x6   :  { %44 = vst.msk [vmem:[#allocation2] sm:$0xff] %vm43_vm1, %v41_v6  ;;  %45 = vst.msk [vmem:[#allocation2 + $0x8] sm:$0xff] %vm43_vm1, %v42_v7  ;;  %292 = vmatpush3.bf16.msra.mxu0 %v315_v2 }
   0x7   :  { %12 = vsyncpa [#allocation4], 0  ;;  %v317_v10 = vld [vmem:[%s444_s3 + $0x10] sm:$0xff]   ;;  %v318_v11 = vld [vmem:[%s444_s3 + $0x8] sm:$0xff]   ;;  %vm152_vm2 = vcmask 523264   ;;  %s348_s20 = smov [#allocation3]  }
   0x8   :  { %300 = vmatpush3.bf16.msra.mxu1 %v317_v10  ;;  %v319_v12 = vld [vmem:[%s444_s3] sm:$0xff]   ;;  %s258_s21 = sshll.u32 %s348_s20, 4  ;;  %s259_s21 = int_to_ptr.vmem [resolvable:$true] %s258_s21 }
   0x9   :  { %294 = vmatmul.mubr.msk.bf16.vlgmr.msra.gmra.mxu0 %vm43_vm1, %v46_v9  ;;  %301 = vmatprep.subr.bf16.mxu1 %v346_v1  ;;  %v270_v13 = vld [vmem:[%s443_s2] ss:$0 sm:$0xff]  ;;  %s324_s22 = scalar_lea.vmem %s259_s21, 256  ;;  %p329_p1 = scmp.lt.s32.totalorder %s259_s21, %s259_s21 }
   0xa   :  { %v279_v52 = vld [vmem:[%s446_s5] ss:$0 sm:$0xff]  ;;  %p325_p0 = scmp.ne.s32.totalorder %s259_s21, %s324_s22  ;;  %p330_p2 = scmp.lt.s32.totalorder %s324_s22, %s324_s22 }
   0xb   :  { %v280_v54 = vld [vmem:[%s447_s6] ss:$0 sm:$0xff] }
   0xc   :  { %302 = vmatpush3.bf16.msra.mxu1 %v318_v11  ;;  %p331_p3 = por %p330_p2, %p329_p1 }
   0xd   :  { %303 = vmatprep.subr.bf16.mxu1 %v346_v1  ;;  %v117_v23 = vld [vmem:[#allocation2] sm:$0xff]  ;;  %v118_v27 = vld [vmem:[#allocation2 + $0x8] sm:$0xff] }
   0xe   :  { %p332_p4 = pnand %p331_p3, %p325_p0 }
  0x10   :  { %304 = vmatpush3.bf16.msra.mxu1 %v319_v12 }
  0xc9   :  { %v108_v14 = vpop.f32.mrf.mxu0 }
  0xca   :  { %v109_v16 = vadd.f32 %v270_v13, %v108_v14 }
  0xcb   :  { %v295_v15 = vpop.f32.mrf.mxu0 }
  0xcc   :  { %v115_v20 = vmax.f32 %v109_v16, 0.0 }
  0xcd   :  { %v111_v17 = vpop.f32.mrf.mxu0 }
  0xce   :  { %v112_v18 = vadd.f32 %v270_v13, %v111_v17 }
  0xcf   :  { %v296_v19 = vpop.f32.mrf.mxu0 }
  0xd0   :  { %v116_v21 = vmax.f32 %v112_v18, 0.0 }
  0xd2   :  { %v119_v22 = vpack.c.bf16 %v116_v21, %v115_v20 }
  0xd4   :  { %306 = vmatmul.mubr.msk.bf16.vlgmr.msra.gmra.mxu1 %vm152_vm2, %v119_v22 }
 0x194   :  { %v190_v24 = vpop.f32.mrf.mxu1 }
 0x195   :  { %v197_v25 = vadd.f32 %v190_v24, %v117_v23 }
 0x196   :  { %v307_v26 = vpop.f32.mrf.mxu1 }
 0x197   :  { %199 = vst.msk [vmem:[#allocation2] sm:$0xff] %vm43_vm1, %v197_v25 }
 0x198   :  { %v193_v28 = vpop.f32.mrf.mxu1 }
 0x199   :  { %v198_v29 = vadd.f32 %v193_v28, %v118_v27 }
 0x19a   :  { %v308_v30 = vpop.f32.mrf.mxu1 }
 0x19b   :  { %200 = vst.msk [vmem:[#allocation2 + $0x8] sm:$0xff] %vm43_vm1, %v198_v29 }
 0x19e   :  { %v204_v31 = vld [vmem:[#allocation2] sm:$0xff] }
 0x19f   :  { %v206_v32 = vsel %vm43_vm1, %v204_v31, 0.0 }
 0x1a0   :  { %207 = vadd.xlane.f32.xlu0 %v206_v32 }
 0x1a2   :  { %v205_v33 = vld [vmem:[#allocation2 + $0x8] sm:$0xff] }
 0x1a3   :  { %v209_v34 = vsel %vm43_vm1, %v205_v33, 0.0 }
 0x1a4   :  { %210 = vadd.xlane.f32.xlu0 %v209_v34 }
 0x229   :  { %v208_v35 = vpop.xlane.xlu0 %207 }
 0x22a   :  { %v213_v36 = vmul.f32 0.03125, %v208_v35 }
 0x22c   :  { %v215_v37 = vsub.f32 %v204_v31, %v213_v36 }
 0x22d   :  { %v211_v38 = vpop.xlane.xlu0 %210 }
 0x22e   :  { %v214_v39 = vmul.f32 0.03125, %v211_v38  ;;  %v217_v40 = vmul.f32 %v215_v37, %v215_v37 }
 0x230   :  { %v216_v41 = vsub.f32 %v205_v33, %v214_v39  ;;  %v219_v42 = vsel %vm43_vm1, %v217_v40, 0.0 }
 0x231   :  { %220 = vadd.xlane.f32.xlu1 %v219_v42 }
 0x232   :  { %v218_v43 = vmul.f32 %v216_v41, %v216_v41 }
 0x234   :  { %v222_v44 = vsel %vm43_vm1, %v218_v43, 0.0 }
 0x235   :  { %223 = vadd.xlane.f32.xlu1 %v222_v44 }
 0x2ba   :  { %v221_v45 = vpop.xlane.xlu1 %220 }
 0x2bb   :  { %v225_v46 = vmul.f32 0.03125, %v221_v45 }
 0x2bd   :  { %v227_v47 = vadd.f32 1e-05, %v225_v46 }
 0x2be   :  { %v224_v48 = vpop.xlane.xlu1 %223 }
 0x2bf   :  { %320 = vrsqrt.f32 %v227_v47  ;;  %v226_v49 = vmul.f32 0.03125, %v224_v48 }
 0x2c1   :  { %v228_v50 = vadd.f32 1e-05, %v226_v49 }
 0x2c3   :  { %322 = vrsqrt.f32 %v228_v50 }
 0x2cc   :  { %v321_v51 = vpop.eup %320 }
 0x2cd   :  { %v231_v53 = vmul.f32 %v321_v51, %v215_v37 }
 0x2cf   :  { %v240_v55 = vmul.f32 %v279_v52, %v231_v53 }
 0x2d0   :  { %v323_v56 = vpop.eup %322 }
 0x2d1   :  { %v232_v57 = vmul.f32 %v323_v56, %v216_v41  ;;  %v249_v58 = vadd.f32 %v280_v54, %v240_v55 }
 0x2d3   :  { %v241_v59 = vmul.f32 %v279_v52, %v232_v57  ;;  %251 = vst.msk [vmem:[#allocation3] sm:$0xff] %vm43_vm1, %v249_v58 }
 0x2d5   :  { %v250_v60 = vadd.f32 %v280_v54, %v241_v59 }
 0x2d7   :  { %252 = vst.msk [vmem:[#allocation3 + $0x8] sm:$0xff] %vm43_vm1, %v250_v60 }
 0x2d8   :  { %335 = shalt.err (!%p332_p4)
}
 0x2d9   :  { %s349_s5 = smov 128   ;;  %s350_s6 = smov 8  }
 0x2da   :  { %264 = dma.vmem_to_hbm [thread:$0]  %s259_s21, 256, %s448_s7, [#allocation4], %s349_s5, %s349_s5, %s350_s6  }
 0x2db   :  { %344 = dma.done.wait [#allocation4], 256  }
 0x2dc   :  { %345 = vsyncadd [#allocation4], 4294967040 }
 0x2dd   :  { %268 = vsyncpa [#allocation4], 1 }

</bundles_post_ra>
